<compile_context>
chip_gen: v7x
topology: tpu7x:2x2x1
jax: 0.10.0
libtpu: 0.0.40
codegen_flags: <defaults>
</compile_context>

<pallas_src>
import functools
import math

import jax
import jax.numpy as jnp
from jax.experimental import pallas as pl
from jax.experimental.pallas import tpu as pltpu


RING = 3  # zero ring kept around the image; >= max conv half-width (7 // 2)


# ----------------------------- Pallas kernels ------------------------------

def _conv_kernel(*refs, k, wp, act, n_inputs):
    """Fused KxK conv (+ bias + per-channel PReLU) on a flattened padded image.

    refs = x_0..x_{n-1}, w_0..w_{n-1}, bias, alpha, mask, out
      x_i   : (1, Cin_i, Fp)     bf16  flattened (Hp*Wp padded to 128) image
      w_i   : (k*k, Cout, Cin_i) bf16  per-tap weights
      bias  : (Cout, 1) f32
      alpha : (Cout, 1) f32            per-channel PReLU slope
      mask  : (1, Fp)   f32            1.0 on interior pixels, 0.0 on ring/tail
      out   : (1, Cout, Fp)

    Because the layout ring width >= k//2 and the input ring/tail are zero,
    the circular roll's wrap-around only lands on ring/tail positions, which
    the interior mask re-zeroes, so interior outputs are exact.
    """
    x_refs = refs[:n_inputs]
    w_refs = refs[n_inputs:2 * n_inputs]
    b_ref, alpha_ref, mask_ref, o_ref = refs[2 * n_inputs:]
    fp = o_ref.shape[2]
    cout = o_ref.shape[1]
    p = k // 2

    xs = [r[0] for r in x_refs]                          # (Cin_i, Fp) bf16
    acc = jnp.zeros((cout, fp), jnp.float32)
    for dy in range(k):
        for dx in range(k):
            t = dy * k + dx
            contrib = jnp.dot(w_refs[0][t], xs[0],
                              preferred_element_type=jnp.float32)
            for i in range(1, n_inputs):
                contrib = contrib + jnp.dot(w_refs[i][t], xs[i],
                                            preferred_element_type=jnp.float32)
            shift = (-((dy - p) * wp + (dx - p))) % fp
            if shift:
                contrib = pltpu.roll(contrib, shift, axis=1)   # XLU slot (free-ish)
            acc = acc + contrib

    y = acc + b_ref[...]
    if act == "prelu":
        y = jnp.where(y >= 0.0, y, alpha_ref[...] * y)
    y = y * mask_ref[...]            # keep the zero ring exact for the next conv
    o_ref[0] = y.astype(o_ref.dtype)


def _tail_kernel(conf_ref, x_ref, w7_ref, b7_ref, w4_ref, o_ref, *, wp):
    """Fused SpatialGate + residual:
       pooled = [max_c, mean_c](conf); s123 = fused 7x7 conv (s1,s2,s3);
       gate = s4(1x1); out = x + conf * sigmoid(gate).
    """
    fp = o_ref.shape[2]
    conf = conf_ref[0].astype(jnp.float32)               # (C, Fp)
    mx = jnp.max(conf, axis=0, keepdims=True)
    mn = jnp.mean(conf, axis=0, keepdims=True)
    pooled = jnp.concatenate([mx, mn], axis=0).astype(w7_ref.dtype)  # (2, Fp)

    acc = jnp.zeros((3, fp), jnp.float32)
    for dy in range(7):
        for dx in range(7):
            t = dy * 7 + dx
            contrib = jnp.dot(w7_ref[t], pooled,
                              preferred_element_type=jnp.float32)    # (3, Fp)
            shift = (-((dy - 3) * wp + (dx - 3))) % fp
            if shift:
                contrib = pltpu.roll(contrib, shift, axis=1)
            acc = acc + contrib

    s123 = acc + b7_ref[...]                              # (3, Fp)
    gate = jnp.sum(w4_ref[...] * s123, axis=0, keepdims=True)        # (1, Fp)
    scale = jax.nn.sigmoid(gate)
    o_ref[0] = (x_ref[0] + conf * scale).astype(o_ref.dtype)


# ------------------------------ call wrappers -------------------------------

def _cout_block(cout):
    """Largest divisor of Cout that is <= 128 and a multiple of 8.

    Big blocks feed the MXU full-height LHS tiles; keeping them <= 128 leaves a
    parallel Cout grid axis for megacore sharding when Cout is large (256 at
    n_feats=64)."""
    for cb in (128, 64, 32, 16, 8):
        if cout % cb == 0:
            return cb
    return cout


def conv_layer(inputs, layer, mask, *, wp, fp):
    """inputs: list of (array (N, C_total, Fp) bf16, channel_block_index).
    The channel slice consumed from input i has size layer['w'][i].shape[-1]
    and starts at channel_block_index * that size (done via BlockSpec)."""
    ws, b, alpha = layer["w"], layer["b"], layer["alpha"]
    k, act = layer["k"], layer["act"]
    n = inputs[0][0].shape[0]
    cout = ws[0].shape[1]
    cb = _cout_block(cout)
    n_in = len(inputs)

    in_specs, args = [], []
    for (arr, cblk), w in zip(inputs, ws):
        cin = w.shape[2]
        # Constant across the (fast-varying) Cout grid axis -> no re-DMA.
        in_specs.append(pl.BlockSpec((1, cin, fp),
                                     lambda i, j, c=cblk: (i, c, 0)))
        args.append(arr)
    for w in ws:
        in_specs.append(pl.BlockSpec((k * k, cb, w.shape[2]),
                                     lambda i, j: (0, j, 0)))
        args.append(w)
    in_specs.append(pl.BlockSpec((cb, 1), lambda i, j: (j, 0)))
    args.append(b)
    in_specs.append(pl.BlockSpec((cb, 1), lambda i, j: (j, 0)))
    args.append(alpha)
    in_specs.append(pl.BlockSpec((1, fp), lambda i, j: (0, 0)))
    args.append(mask)

    kern = functools.partial(_conv_kernel, k=k, wp=wp, act=act, n_inputs=n_in)
    return pl.pallas_call(
        kern,
        out_shape=jax.ShapeDtypeStruct((n, cout, fp), jnp.bfloat16),
        grid=(n, cout // cb),
        in_specs=in_specs,
        out_specs=pl.BlockSpec((1, cb, fp), lambda i, j: (i, j, 0)),
        compiler_params=pltpu.CompilerParams(
            dimension_semantics=("parallel", "parallel"),
            vmem_limit_bytes=32 * 1024 * 1024),
    )(*args)


def spatial_gate_residual(conf, x_flat_f32, layers, *, wp, fp):
    n, c, _ = conf.shape
    kern = functools.partial(_tail_kernel, wp=wp)
    return pl.pallas_call(
        kern,
        out_shape=jax.ShapeDtypeStruct((n, c, fp), jnp.float32),
        grid=(n,),
        in_specs=[
            pl.BlockSpec((1, c, fp), lambda i: (i, 0, 0)),
            pl.BlockSpec((1, c, fp), lambda i: (i, 0, 0)),
            pl.BlockSpec((49, 3, 2), lambda i: (0, 0, 0)),
            pl.BlockSpec((3, 1), lambda i: (0, 0)),
            pl.BlockSpec((3, 1), lambda i: (0, 0)),
        ],
        out_specs=pl.BlockSpec((1, c, fp), lambda i: (i, 0, 0)),
        compiler_params=pltpu.CompilerParams(
            dimension_semantics=("parallel",),
            vmem_limit_bytes=32 * 1024 * 1024),
    )(conf, x_flat_f32, layers["att_w7"], layers["att_b7"], layers["att_w4"])


# ------------------------------- parameters --------------------------------

def _fold_bn(w, b, gamma, beta, mean, var, eps=1e-5):
    scale = gamma / jnp.sqrt(var + eps)
    return w * scale.reshape(-1, 1, 1, 1), (b - mean) * scale + beta


def init_params(n_feats, key):
    def split():
        nonlocal key
        key, sub = jax.random.split(key)
        return sub

    def conv(cin, cout, k, bias=True):
        fan_in = cin * k * k
        w = jax.random.normal(split(), (cout, cin, k, k), jnp.float32) / math.sqrt(fan_in)
        if bias:
            b = 0.01 * jax.random.normal(split(), (cout,), jnp.float32)
        else:
            b = jnp.zeros((cout,), jnp.float32)
        return w, b

    def bn_conv(cin, cout, k):
        # common.BasicBlock(bn=True, act=False): conv(bias=False) + BatchNorm2d
        # (eval mode, fresh running stats) folded into an equivalent conv.
        w, b = conv(cin, cout, k, bias=False)
        gamma = jnp.ones((cout,), jnp.float32)
        beta = jnp.zeros((cout,), jnp.float32)
        mean = jnp.zeros((cout,), jnp.float32)
        var = jnp.ones((cout,), jnp.float32)
        return _fold_bn(w, b, gamma, beta, mean, var)

    return {
        "conv_3_1": conv(n_feats, n_feats, 3),
        "conv_3_2": conv(2 * n_feats, 2 * n_feats, 3),
        "conv_5_1a": conv(n_feats, n_feats, 3),
        "conv_5_1b": conv(n_feats, n_feats, 3),
        "conv_5_2a": conv(2 * n_feats, 2 * n_feats, 3),
        "conv_5_2b": conv(2 * n_feats, 2 * n_feats, 3),
        "confusion": conv(4 * n_feats, n_feats, 1),
        "att_s1": bn_conv(2, 1, 3),
        "att_s2": bn_conv(2, 1, 5),
        "att_s3": bn_conv(2, 1, 7),
        "att_s4": conv(3, 1, 1, bias=False),   # BasicBlock default bias=False
        "prelu_alpha": 0.25,      # MSRB.prelu (shared, scalar, PyTorch init)
        "prelu5_1_alpha": 0.25,   # conv5 internal PReLU (conv_5_1)
        "prelu5_2_alpha": 0.25,   # conv5 internal PReLU (conv_5_2)
    }


def prepare_params(params, n_feats):
    """Fold / fuse the PyTorch-layout parameters into kernel-ready tensors."""
    nf = n_feats
    a = jnp.float32(params["prelu_alpha"])
    a51 = jnp.float32(params["prelu5_1_alpha"])
    a52 = jnp.float32(params["prelu5_2_alpha"])

    def taps(w):  # (Cout, Cin, k, k) -> (k*k, Cout, Cin) bf16
        co, ci, kh, kw = w.shape
        return jnp.transpose(w, (2, 3, 0, 1)).reshape(kh * kw, co, ci).astype(jnp.bfloat16)

    def col(v):
        return v.reshape(-1, 1).astype(jnp.float32)

    def alpha_vec(parts):
        return jnp.concatenate(
            [jnp.full((cnt,), al, jnp.float32) for al, cnt in parts]).reshape(-1, 1)

    w31, b31 = params["conv_3_1"]
    w51a, b51a = params["conv_5_1a"]
    w51b, b51b = params["conv_5_1b"]
    w32, b32 = params["conv_3_2"]
    w52a, b52a = params["conv_5_2a"]
    w52b, b52b = params["conv_5_2b"]
    wc, bc = params["confusion"]

    layers = {}
    # conv_3_1 and conv_5_1a share input x -> fuse along Cout.
    layers["A"] = dict(
        k=3, act="prelu",
        w=[taps(jnp.concatenate([w31, w51a], axis=0))],
        b=col(jnp.concatenate([b31, b51a])),
        alpha=alpha_vec([(a, nf), (a51, nf)]))
    layers["c51b"] = dict(k=3, act="prelu", w=[taps(w51b)], b=col(b51b),
                          alpha=alpha_vec([(a, nf)]))
    # conv_3_2 and conv_5_2a share input_2 = [out_3_1, out_5_1] -> Cout-fuse +
    # K-split the input channels so input_2 is never materialised.
    layers["B"] = dict(
        k=3, act="prelu",
        w=[taps(jnp.concatenate([w32[:, :nf], w52a[:, :nf]], axis=0)),
           taps(jnp.concatenate([w32[:, nf:], w52a[:, nf:]], axis=0))],
        b=col(jnp.concatenate([b32, b52a])),
        alpha=alpha_vec([(a, 2 * nf), (a52, 2 * nf)]))
    layers["c52b"] = dict(k=3, act="prelu", w=[taps(w52b)], b=col(b52b),
                          alpha=alpha_vec([(a, 2 * nf)]))
    # confusion (1x1) over input_3 = [out_3_2, out_5_2] -> K-split, no concat.
    layers["conf"] = dict(
        k=1, act="none",
        w=[taps(wc[:, :2 * nf]), taps(wc[:, 2 * nf:])],
        b=col(bc),
        alpha=jnp.zeros((nf, 1), jnp.float32))

    # SpatialGate: zero-pad the 3x3 / 5x5 attention kernels to 7x7 and stack
    # them into one 7x7 conv with Cout=3 (s1, s2, s3).
    def pad_to7(w):
        kk = w.shape[-1]
        off = (7 - kk) // 2
        out = jnp.zeros((w.shape[0], w.shape[1], 7, 7), w.dtype)
        return out.at[:, :, off:off + kk, off:off + kk].set(w)

    w_s1, b_s1 = params["att_s1"]
    w_s2, b_s2 = params["att_s2"]
    w_s3, b_s3 = params["att_s3"]
    w_s4, _ = params["att_s4"]
    w7 = jnp.concatenate([pad_to7(w_s1), pad_to7(w_s2), pad_to7(w_s3)], axis=0)
    layers["att_w7"] = taps(w7)                                     # (49, 3, 2)
    layers["att_b7"] = col(jnp.concatenate([b_s1, b_s2, b_s3]))     # (3, 1)
    layers["att_w4"] = w_s4.reshape(1, 3).T.astype(jnp.float32)     # (3, 1)
    return layers


# ------------------------------- MSRB forward -------------------------------

def msrb_forward(x, layers):
    n, c, h, w = x.shape
    hp, wp = h + 2 * RING, w + 2 * RING
    f_real = hp * wp
    fp = ((f_real + 127) // 128) * 128   # lane-dense flattened spatial dim

    # module-boundary layout conversion (the only XLA-side data movement)
    x_pad = jnp.pad(x, ((0, 0), (0, 0), (RING, RING), (RING, RING)))
    x_flat = jnp.pad(x_pad.reshape(n, c, f_real),
                     ((0, 0), (0, 0), (0, fp - f_real)))
    x_bf = x_flat.astype(jnp.bfloat16)

    idx = jnp.arange(fp)
    yy, xx = idx // wp, idx % wp
    mask = ((idx < f_real) & (yy >= RING) & (yy < RING + h)
            & (xx >= RING) & (xx < RING + w)).astype(jnp.float32).reshape(1, fp)

    # trunk: 5 fused conv kernels (was 7 convs + 2 concats)
    fa = conv_layer([(x_bf, 0)], layers["A"], mask, wp=wp, fp=fp)        # (N,2nf,Fp)
    out51 = conv_layer([(fa, 1)], layers["c51b"], mask, wp=wp, fp=fp)    # (N, nf,Fp)
    fb = conv_layer([(fa, 0), (out51, 0)], layers["B"], mask, wp=wp, fp=fp)   # (N,4nf,Fp)
    out52 = conv_layer([(fb, 1)], layers["c52b"], mask, wp=wp, fp=fp)    # (N,2nf,Fp)
    conf = conv_layer([(fb, 0), (out52, 0)], layers["conf"], mask, wp=wp, fp=fp)  # (N,nf,Fp)

    # fused SpatialGate + residual (ChannelPool, s1/s2/s3, s4, sigmoid, +x)
    out = spatial_gate_residual(conf, x_flat, layers, wp=wp, fp=fp)      # (N,nf,Fp)

    out = out[:, :, :f_real].reshape(n, c, hp, wp)
    return out[:, :, RING:RING + h, RING:RING + w]


# ----------------------------------- main -----------------------------------

if __name__ == "__main__":
    key = jax.random.PRNGKey(0)
    pkey, xkey = jax.random.split(key)
    n_feats, batch, height, width = 8, 2, 16, 16

    params = init_params(n_feats, pkey)
    layers = prepare_params(params, n_feats)
    x = jax.random.normal(xkey, (batch, n_feats, height, width), jnp.float32)

    out = msrb_forward(x, layers)
    jax.block_until_ready(out)
    assert out.shape == x.shape and out.dtype == jnp.float32
    print("KERNEL_OK")
</pallas_src>

<mosaic_0001>
module attributes {stable_mosaic.version = 11 : i64} {
  func.func @_conv_kernel(%arg0: i32, %arg1: i32, %arg2: memref<1x8x512xbf16, #tpu.memory_space<vmem>>, %arg3: memref<9x16x8xbf16, #tpu.memory_space<vmem>>, %arg4: memref<16x1xf32, #tpu.memory_space<vmem>>, %arg5: memref<16x1xf32, #tpu.memory_space<vmem>>, %arg6: memref<1x512xf32, #tpu.memory_space<vmem>>, %arg7: memref<1x16x512xbf16, #tpu.memory_space<vmem>>) attributes {dimension_semantics = [#tpu.dimension_semantics<parallel>, #tpu.dimension_semantics<parallel>], iteration_bounds = array<i64: 2, 1>, scalar_prefetch = 0 : i64, scratch_operands = 0 : i64, tpu.core_type = #tpu.core_type<tc>, window_params = [{transform_indices = @transform_0, window_bounds = array<i64: 1, 8, 512>}, {transform_indices = @transform_1, window_bounds = array<i64: 9, 16, 8>}, {transform_indices = @transform_2, window_bounds = array<i64: 16, 1>}, {transform_indices = @transform_3, window_bounds = array<i64: 16, 1>}, {pipeline_mode = #tpu.pipeline_mode<synchronous>, transform_indices = @transform_4, window_bounds = array<i64: 1, 512>}, {transform_indices = @transform_5, window_bounds = array<i64: 1, 16, 512>}]} {
    %c0 = arith.constant 0 : index
    %c0_0 = arith.constant 0 : index
    %c0_1 = arith.constant 0 : index
    %0 = vector.load %arg2[%c0, %c0_0, %c0_1] : memref<1x8x512xbf16, #tpu.memory_space<vmem>>, vector<1x8x512xbf16>
    %1 = vector.shape_cast %0 : vector<1x8x512xbf16> to vector<8x512xbf16>
    %cst = arith.constant 0.000000e+00 : f32
    %2 = vector.broadcast %cst : f32 to vector<16x512xf32>
    %c0_2 = arith.constant 0 : index
    %c0_3 = arith.constant 0 : index
    %c0_4 = arith.constant 0 : index
    %3 = vector.load %arg3[%c0_2, %c0_3, %c0_4] : memref<9x16x8xbf16, #tpu.memory_space<vmem>>, vector<1x16x8xbf16>
    %4 = vector.shape_cast %3 : vector<1x16x8xbf16> to vector<16x8xbf16>
    %cst_5 = arith.constant dense<0.000000e+00> : vector<16x512xf32>
    %5 = tpu.matmul %4, %1, %cst_5 {dimension_numbers = #tpu.dot_dimension_numbers<[1], [0], [0], [1], [0, 0, 1, 1], [], []>} : vector<16x8xbf16>, vector<8x512xbf16>, vector<16x512xf32> -> vector<16x512xf32>
    %c23_i32 = arith.constant 23 : i32
    %6 = tpu.dynamic_rotate %5 by %c23_i32 dim 1 : vector<16x512xf32>, i32 -> vector<16x512xf32>
    %7 = arith.addf %2, %6 : vector<16x512xf32>
    %c1 = arith.constant 1 : index
    %c0_6 = arith.constant 0 : index
    %c0_7 = arith.constant 0 : index
    %8 = vector.load %arg3[%c1, %c0_6, %c0_7] : memref<9x16x8xbf16, #tpu.memory_space<vmem>>, vector<1x16x8xbf16>
    %9 = vector.shape_cast %8 : vector<1x16x8xbf16> to vector<16x8xbf16>
    %cst_8 = arith.constant dense<0.000000e+00> : vector<16x512xf32>
    %10 = tpu.matmul %9, %1, %cst_8 {dimension_numbers = #tpu.dot_dimension_numbers<[1], [0], [0], [1], [0, 0, 1, 1], [], []>} : vector<16x8xbf16>, vector<8x512xbf16>, vector<16x512xf32> -> vector<16x512xf32>
    %c22_i32 = arith.constant 22 : i32
    %11 = tpu.dynamic_rotate %10 by %c22_i32 dim 1 : vector<16x512xf32>, i32 -> vector<16x512xf32>
    %12 = arith.addf %7, %11 : vector<16x512xf32>
    %c2 = arith.constant 2 : index
    %c0_9 = arith.constant 0 : index
    %c0_10 = arith.constant 0 : index
    %13 = vector.load %arg3[%c2, %c0_9, %c0_10] : memref<9x16x8xbf16, #tpu.memory_space<vmem>>, vector<1x16x8xbf16>
    %14 = vector.shape_cast %13 : vector<1x16x8xbf16> to vector<16x8xbf16>
    %cst_11 = arith.constant dense<0.000000e+00> : vector<16x512xf32>
    %15 = tpu.matmul %14, %1, %cst_11 {dimension_numbers = #tpu.dot_dimension_numbers<[1], [0], [0], [1], [0, 0, 1, 1], [], []>} : vector<16x8xbf16>, vector<8x512xbf16>, vector<16x512xf32> -> vector<16x512xf32>
    %c21_i32 = arith.constant 21 : i32
    %16 = tpu.dynamic_rotate %15 by %c21_i32 dim 1 : vector<16x512xf32>, i32 -> vector<16x512xf32>
    %17 = arith.addf %12, %16 : vector<16x512xf32>
    %c3 = arith.constant 3 : index
    %c0_12 = arith.constant 0 : index
    %c0_13 = arith.constant 0 : index
    %18 = vector.load %arg3[%c3, %c0_12, %c0_13] : memref<9x16x8xbf16, #tpu.memory_space<vmem>>, vector<1x16x8xbf16>
    %19 = vector.shape_cast %18 : vector<1x16x8xbf16> to vector<16x8xbf16>
    %cst_14 = arith.constant dense<0.000000e+00> : vector<16x512xf32>
    %20 = tpu.matmul %19, %1, %cst_14 {dimension_numbers = #tpu.dot_dimension_numbers<[1], [0], [0], [1], [0, 0, 1, 1], [], []>} : vector<16x8xbf16>, vector<8x512xbf16>, vector<16x512xf32> -> vector<16x512xf32>
    %c1_i32 = arith.constant 1 : i32
    %21 = tpu.dynamic_rotate %20 by %c1_i32 dim 1 : vector<16x512xf32>, i32 -> vector<16x512xf32>
    %22 = arith.addf %17, %21 : vector<16x512xf32>
    %c4 = arith.constant 4 : index
    %c0_15 = arith.constant 0 : index
    %c0_16 = arith.constant 0 : index
    %23 = vector.load %arg3[%c4, %c0_15, %c0_16] : memref<9x16x8xbf16, #tpu.memory_space<vmem>>, vector<1x16x8xbf16>
    %24 = vector.shape_cast %23 : vector<1x16x8xbf16> to vector<16x8xbf16>
    %cst_17 = arith.constant dense<0.000000e+00> : vector<16x512xf32>
    %25 = tpu.matmul %24, %1, %cst_17 {dimension_numbers = #tpu.dot_dimension_numbers<[1], [0], [0], [1], [0, 0, 1, 1], [], []>} : vector<16x8xbf16>, vector<8x512xbf16>, vector<16x512xf32> -> vector<16x512xf32>
    %26 = arith.addf %22, %25 : vector<16x512xf32>
    %c5 = arith.constant 5 : index
    %c0_18 = arith.constant 0 : index
    %c0_19 = arith.constant 0 : index
    %27 = vector.load %arg3[%c5, %c0_18, %c0_19] : memref<9x16x8xbf16, #tpu.memory_space<vmem>>, vector<1x16x8xbf16>
    %28 = vector.shape_cast %27 : vector<1x16x8xbf16> to vector<16x8xbf16>
    %cst_20 = arith.constant dense<0.000000e+00> : vector<16x512xf32>
    %29 = tpu.matmul %28, %1, %cst_20 {dimension_numbers = #tpu.dot_dimension_numbers<[1], [0], [0], [1], [0, 0, 1, 1], [], []>} : vector<16x8xbf16>, vector<8x512xbf16>, vector<16x512xf32> -> vector<16x512xf32>
    %c511_i32 = arith.constant 511 : i32
    %30 = tpu.dynamic_rotate %29 by %c511_i32 dim 1 : vector<16x512xf32>, i32 -> vector<16x512xf32>
    %31 = arith.addf %26, %30 : vector<16x512xf32>
    %c6 = arith.constant 6 : index
    %c0_21 = arith.constant 0 : index
    %c0_22 = arith.constant 0 : index
    %32 = vector.load %arg3[%c6, %c0_21, %c0_22] : memref<9x16x8xbf16, #tpu.memory_space<vmem>>, vector<1x16x8xbf16>
    %33 = vector.shape_cast %32 : vector<1x16x8xbf16> to vector<16x8xbf16>
    %cst_23 = arith.constant dense<0.000000e+00> : vector<16x512xf32>
    %34 = tpu.matmul %33, %1, %cst_23 {dimension_numbers = #tpu.dot_dimension_numbers<[1], [0], [0], [1], [0, 0, 1, 1], [], []>} : vector<16x8xbf16>, vector<8x512xbf16>, vector<16x512xf32> -> vector<16x512xf32>
    %c491_i32 = arith.constant 491 : i32
    %35 = tpu.dynamic_rotate %34 by %c491_i32 dim 1 : vector<16x512xf32>, i32 -> vector<16x512xf32>
    %36 = arith.addf %31, %35 : vector<16x512xf32>
    %c7 = arith.constant 7 : index
    %c0_24 = arith.constant 0 : index
    %c0_25 = arith.constant 0 : index
    %37 = vector.load %arg3[%c7, %c0_24, %c0_25] : memref<9x16x8xbf16, #tpu.memory_space<vmem>>, vector<1x16x8xbf16>
    %38 = vector.shape_cast %37 : vector<1x16x8xbf16> to vector<16x8xbf16>
    %cst_26 = arith.constant dense<0.000000e+00> : vector<16x512xf32>
    %39 = tpu.matmul %38, %1, %cst_26 {dimension_numbers = #tpu.dot_dimension_numbers<[1], [0], [0], [1], [0, 0, 1, 1], [], []>} : vector<16x8xbf16>, vector<8x512xbf16>, vector<16x512xf32> -> vector<16x512xf32>
    %c490_i32 = arith.constant 490 : i32
    %40 = tpu.dynamic_rotate %39 by %c490_i32 dim 1 : vector<16x512xf32>, i32 -> vector<16x512xf32>
    %41 = arith.addf %36, %40 : vector<16x512xf32>
    %c8 = arith.constant 8 : index
    %c0_27 = arith.constant 0 : index
    %c0_28 = arith.constant 0 : index
    %42 = vector.load %arg3[%c8, %c0_27, %c0_28] : memref<9x16x8xbf16, #tpu.memory_space<vmem>>, vector<1x16x8xbf16>
    %43 = vector.shape_cast %42 : vector<1x16x8xbf16> to vector<16x8xbf16>
    %cst_29 = arith.constant dense<0.000000e+00> : vector<16x512xf32>
    %44 = tpu.matmul %43, %1, %cst_29 {dimension_numbers = #tpu.dot_dimension_numbers<[1], [0], [0], [1], [0, 0, 1, 1], [], []>} : vector<16x8xbf16>, vector<8x512xbf16>, vector<16x512xf32> -> vector<16x512xf32>
    %c489_i32 = arith.constant 489 : i32
    %45 = tpu.dynamic_rotate %44 by %c489_i32 dim 1 : vector<16x512xf32>, i32 -> vector<16x512xf32>
    %46 = arith.addf %41, %45 : vector<16x512xf32>
    %c0_30 = arith.constant 0 : index
    %c0_31 = arith.constant 0 : index
    %47 = vector.load %arg4[%c0_30, %c0_31] : memref<16x1xf32, #tpu.memory_space<vmem>>, vector<16x1xf32>
    %48 = vector.broadcast %47 : vector<16x1xf32> to vector<16x512xf32>
    %49 = arith.addf %46, %48 : vector<16x512xf32>
    %cst_32 = arith.constant 0.000000e+00 : f32
    %50 = vector.broadcast %cst_32 : f32 to vector<16x512xf32>
    %51 = arith.cmpf oge, %49, %50 : vector<16x512xf32>
    %c0_33 = arith.constant 0 : index
    %c0_34 = arith.constant 0 : index
    %52 = vector.load %arg5[%c0_33, %c0_34] : memref<16x1xf32, #tpu.memory_space<vmem>>, vector<16x1xf32>
    %53 = vector.broadcast %52 : vector<16x1xf32> to vector<16x512xf32>
    %54 = arith.mulf %53, %49 : vector<16x512xf32>
    %55 = arith.select %51, %49, %54 : vector<16x512xi1>, vector<16x512xf32>
    %c0_35 = arith.constant 0 : index
    %c0_36 = arith.constant 0 : index
    %56 = vector.load %arg6[%c0_35, %c0_36] : memref<1x512xf32, #tpu.memory_space<vmem>>, vector<1x512xf32>
    %57 = vector.broadcast %56 : vector<1x512xf32> to vector<16x512xf32>
    %58 = arith.mulf %55, %57 : vector<16x512xf32>
    %59 = arith.truncf %58 : vector<16x512xf32> to vector<16x512xbf16>
    %c0_37 = arith.constant 0 : index
    %c0_38 = arith.constant 0 : index
    %c0_39 = arith.constant 0 : index
    %60 = vector.load %arg7[%c0_37, %c0_38, %c0_39] : memref<1x16x512xbf16, #tpu.memory_space<vmem>>, vector<1x16x512xbf16>
    %61 = vector.shape_cast %60 : vector<1x16x512xbf16> to vector<16x512xbf16>
    %62 = vector.shape_cast %59 : vector<16x512xbf16> to vector<1x16x512xbf16>
    tpu.vector_store %arg7[%c0_37, %c0_38, %c0_39], %62 {strides = array<i32>} : memref<1x16x512xbf16, #tpu.memory_space<vmem>>, vector<1x16x512xbf16>,
    return
  }
  func.func @transform_0(%arg0: i32, %arg1: i32) -> (i32, i32, i32) {
    %c0_i32 = arith.constant 0 : i32
    %c0_i32_0 = arith.constant 0 : i32
    %c0_i32_1 = arith.constant 0 : i32
    return %arg0, %c0_i32, %c0_i32_0 : i32, i32, i32
  }
  func.func @transform_1(%arg0: i32, %arg1: i32) -> (i32, i32, i32) {
    %c0_i32 = arith.constant 0 : i32
    %c0_i32_0 = arith.constant 0 : i32
    %c0_i32_1 = arith.constant 0 : i32
    return %c0_i32, %arg1, %c0_i32_0 : i32, i32, i32
  }
  func.func @transform_2(%arg0: i32, %arg1: i32) -> (i32, i32) {
    %c0_i32 = arith.constant 0 : i32
    %c0_i32_0 = arith.constant 0 : i32
    return %arg1, %c0_i32 : i32, i32
  }
  func.func @transform_3(%arg0: i32, %arg1: i32) -> (i32, i32) {
    %c0_i32 = arith.constant 0 : i32
    %c0_i32_0 = arith.constant 0 : i32
    return %arg1, %c0_i32 : i32, i32
  }
  func.func @transform_4(%arg0: i32, %arg1: i32) -> (i32, i32) {
    %c0_i32 = arith.constant 0 : i32
    %c0_i32_0 = arith.constant 0 : i32
    %c0_i32_1 = arith.constant 0 : i32
    return %c0_i32, %c0_i32_0 : i32, i32
  }
  func.func @transform_5(%arg0: i32, %arg1: i32) -> (i32, i32, i32) {
    %c0_i32 = arith.constant 0 : i32
    %c0_i32_0 = arith.constant 0 : i32
    return %arg0, %arg1, %c0_i32 : i32, i32, i32
  }
}

</mosaic_0001>

<bundles_post_ra>
// kernel: tpu_custom_call.1
= control target key start
LH: loop header
LB: loop body
LE: loop exit
PB: predicated region body
PF: predicated region fallthrough
CT: control target
= control target key end

     0   :  { %10 = vsyncpa [#allocation3], 0  ;;  %s2520_s0 = inlined_call_operand.vmem [shape: bf16[2,8,512], index: 0, kind: input, shape index: {}]   ;;  %s2521_s1 = inlined_call_operand.vmem [shape: bf16[9,16,8], index: 1, kind: input, shape index: {}]   ;;  %s2522_s2 = inlined_call_operand.vmem [shape: f32[16,1], index: 2, kind: input, shape index: {}]   ;;  %s2523_s3 = inlined_call_operand.vmem [shape: f32[16,1], index: 3, kind: input, shape index: {}]   ;;  %s2524_s4 = inlined_call_operand.vmem [shape: f32[1,512], index: 4, kind: input, shape index: {}]   ;;  %s2525_s5 = inlined_call_operand.hbm [shape: bf16[2,16,512], index: 5, kind: output, shape index: {}]  }
   0x1   :  { %12 = vsyncpa [#allocation3 + $0x1], 0  ;;  %s2020_s18 = smov 0   ;;  %s2022_s19 = smov 0  }
   0x2   :  { %s2024_s20 = smov 0   ;;  %s2026_s21 = smov 0  }
   0x3   :  { %s2028_s22 = smov 0   ;;  %s2030_s23 = smov 0  }
   0x4 LB: > { %s1726_s24 = sadd.s32 4294967295, %s1976_s23   ;;  %s1727_s25 = sadd.s32 4294967294, %s1976_s23   ;;  %s1976_s23 = sphi %s2030_s23, %s18_s23   ;;  %s1972_s22 = sphi %s2028_s22, %s2532_s22   ;;  %s1968_s21 = sphi %s2026_s21, %s2531_s21   ;;  %s1964_s20 = sphi %s2024_s20, %s2530_s20   ;;  %s1960_s19 = sphi %s2022_s19, %s2529_s19   ;;  %s1956_s18 = sphi %s2020_s18, %s2528_s18  }
   0x5   : > { %s30_s26 = sadd.s32 1, %s1972_s22  ;;  %s164_s27 = sadd.s32 1, %s1964_s20 }
   0x6   : > { %p32_p0 = scmp.ge.s32.totalorder %s30_s26, 2  ;;  %p174_p1 = scmp.ne.s32.totalorder %s1964_s20, %s1960_s19 }
   0x7   : > { %p175_p2 = scmp.eq.s32.totalorder %s1726_s24, 1  ;;  %p180_p3 = scmp.ne.s32.totalorder %s1960_s19, %s1956_s18 }
   0x8   : > { %s2534_s26 = smov (%p32_p0, %s30_s26), 0  ;;  %p181_p5 = scmp.eq.s32.totalorder %s1727_s25, 1 }
   0x9   : > { %p2060_p4 = por %p175_p2, %p174_p1  ;;  %s159_s29 = ssub.s32 %s1972_s22, %s2534_s26 }
   0xa   : > { %p1733_p6 = scmp.ge.s32.totalorder %s1976_s23, 1  ;;  %p162_p7 = scmp.eq.s32.totalorder %s159_s29, 0 }
   0xb   : > { %p2067_p8 = por %p181_p5, %p180_p3  ;;  %p237_p9 = scmp.lt.s32.totalorder %s1976_s23, 3 }
   0xc   : > { %s2073_s6 = scalar_select %p162_p7, %s1964_s20, %s164_s27  }
   0xd   : > { %p238_p10 = pnand %p1733_p6, %p237_p9 }
   0xe   : > { %p280_p11 = scmp.lt.s32.totalorder (!%p238_p10), %s1968_s21, 1  ;;  %v1978_v0 = vmov (!%p238_p10), 0   ;;  %vm328_vm0 = vcmask (!%p238_p10), 1043456   ;;  %v1889_v7 = vld [vmem:[%s2521_s1] sm:$0xff] (!%p238_p10)   ;;  %vm324_vm1 = vcmask (!%p238_p10), 64512   ;;  %v1478_v10 = vld [vmem:[%s2522_s2 + $0x8] sm:$0xff] (!%p238_p10) }
   0xf   : > { %241 = sbr.rel (%p238_p10) target bundleno = 518 (0x206), region = 40  ;;  %373 = vmatprep.mubr.bf16.mxu0 (!%p238_p10), %v1978_v0  ;;  %416 = vmatprep.mubr.bf16.mxu1 (!%p238_p10), %v1978_v0  ;;  %v1477_v11 = vld [vmem:[%s2522_s2] sm:$0xff] (!%p238_p10)  ;;  %v1506_v13 = vld [vmem:[%s2523_s3 + $0x8] sm:$0xff] (!%p238_p10)  ;;  %v1891_v15 = vld [vmem:[%s2521_s1 + $0x10] sm:$0xff] (!%p238_p10)   ;;  %s1980_s9 = smov (!%p238_p10), 22  }
  0x10   : > { %1884 = vset.pattern.permute.xlu1 (!%p238_p10), %v1978_v0  ;;  %1883 = vset.pattern.permute.xlu0 (!%p238_p10), %v1978_v0  ;;  %v1505_v12 = vld [vmem:[%s2523_s3] sm:$0xff] (!%p238_p10)  ;;  %v1890_v14 = vld [vmem:[%s2521_s1 + $0x8] sm:$0xff] (!%p238_p10)   ;;  %v1892_v16 = vld [vmem:[%s2521_s1 + $0x18] sm:$0xff] (!%p238_p10)   ;;  %s1981_s10 = smov (!%p238_p10), 21   ;;  %s1983_s12 = smov (!%p238_p10), 127  }
  0x11   : > { %1486 = vperm.xlu1 (!%p238_p10), %1884, %v1478_v10   ;;  %1481 = vperm.xlu0 (!%p238_p10), %1883, %v1477_v11   ;;  %v1893_v17 = vld [vmem:[%s2521_s1 + $0x20] sm:$0xff] (!%p238_p10)   ;;  %v1894_v18 = vld [vmem:[%s2521_s1 + $0x28] sm:$0xff] (!%p238_p10)   ;;  %v1895_v19 = vld [vmem:[%s2521_s1 + $0x30] sm:$0xff] (!%p238_p10)   ;;  %s1984_s13 = smov (!%p238_p10), 107   ;;  %s1985_s14 = smov (!%p238_p10), 106  }
  0x12   : > { %v1896_v20 = vld [vmem:[%s2521_s1 + $0x38] sm:$0xff] (!%p238_p10)   ;;  %v1897_v21 = vld [vmem:[%s2521_s1 + $0x40] sm:$0xff] (!%p238_p10)   ;;  %s1986_s15 = smov (!%p238_p10), 105   ;;  %s277_s24 = sand.u32 (!%p238_p10), 1, %s1960_s19  }
  0x13   : > { %s1734_s25 = sshll.u32 (!%p238_p10), %s277_s24, 5  ;;  %s1816_s29 = sshll.u32 (!%p238_p10), %s1968_s21, 9 }
  0x14   : > { %s279_s27 = scalar_lea.vmem (!%p238_p10), [#allocation2], %s1734_s25 }
  0x15   : > { %1509 = vperm.xlu1 (!%p238_p10), %1884, %v1505_v12   ;;  %1514 = vperm.xlu0 (!%p238_p10), %1883, %v1506_v13  }
  0x16   : > { %s281_s7 = scalar_select %p280_p11, %s1968_s21, 1 }
  0x17   : > { %s2474_s21 = scalar_lea.sflag [#allocation3], %s277_s24 }
  0x18   : > { %s1811_s8 = sshll.u32 %s281_s7, 4  ;;  %s1608_s7 = sshll.u32 %s279_s27, 4  ;;  %s2470_s7 = int_to_ptr.vmem [resolvable:$true] %s1608_s7 }
  0x19   : > { %s284_s11 = scalar_lea.vmem %s2520_s0, %s1811_s8  ;;  %s1979_s8 = smov 23  }
  0x1a   : > { %v305_v1 = vld [vmem:[%s284_s11] sm:$0xff]  ;;  %v306_v2 = vld [vmem:[%s284_s11 + $0x8] sm:$0xff]  ;;  %s1982_s11 = smov 1  }
  0x1b   : > { %v2084_v3 = vcombine.high %v305_v1, %v305_v1  ;;  %v2086_v4 = vcombine.high %v306_v2, %v306_v2  ;;  %v1738_v5 = vcombine.low %v305_v1, %v305_v1  ;;  %v1740_v6 = vcombine.low %v306_v2, %v306_v2 }
  0x1d   : > { %1742 = vmatprep.subr.msk.bf16.mxu0 %vm328_vm0, %v2084_v3  ;;  %1744 = vmatprep.subr.msk.bf16.mxu1 %vm328_vm0, %v2086_v4  ;;  %v2096_v8 = vsel %vm328_vm0, %v1738_v5, 0  ;;  %v2099_v9 = vsel %vm328_vm0, %v1740_v6, 0 }
  0x1e   : > { %342 = vmatpush1.bf16.msra.mxu0 %v2096_v8  ;;  %385 = vmatpush1.bf16.msra.mxu1 %v2099_v9 }
  0x1f   : > { %1749 = vmatprep.subr.msk.bf16.mxu0 %vm328_vm0, %v2084_v3  ;;  %1751 = vmatprep.subr.msk.bf16.mxu1 %vm328_vm0, %v2086_v4 }
  0x21   : > { %1743 = vmatmul.mubr.msk.bf16.vlgmr.msra.gmra.mrb[0].mxu0 %vm324_vm1, %v1889_v7  ;;  %1745 = vmatmul.mubr.msk.bf16.vlgmr.msra.gmra.mrb[0].mxu1 %vm324_vm1, %v1889_v7 }
  0x22   : > { %474 = vmatpush1.bf16.msra.mxu0 %v2096_v8  ;;  %505 = vmatprep.mubr.bf16.mxu0 %v1978_v0 }
  0x23   : > { %517 = vmatpush1.bf16.msra.mxu1 %v2099_v9  ;;  %548 = vmatprep.mubr.bf16.mxu1 %v1978_v0 }
  0x24   : > { %1756 = vmatprep.subr.msk.bf16.mxu0 %vm328_vm0, %v2084_v3  ;;  %1758 = vmatprep.subr.msk.bf16.mxu1 %vm328_vm0, %v2086_v4 }
  0x29   : > { %1750 = vmatmul.mubr.msk.bf16.vlgmr.msra.gmra.mrb[4].mxu0 %vm324_vm1, %v1890_v14  ;;  %1752 = vmatmul.mubr.msk.bf16.vlgmr.msra.gmra.mrb[4].mxu1 %vm324_vm1, %v1890_v14 }
  0x2a   : > { %604 = vmatpush1.bf16.msra.mxu0 %v2096_v8  ;;  %635 = vmatprep.mubr.bf16.mxu0 %v1978_v0 }
  0x2b   : > { %647 = vmatpush1.bf16.msra.mxu1 %v2099_v9  ;;  %678 = vmatprep.mubr.bf16.mxu1 %v1978_v0 }
  0x2c   : > { %1763 = vmatprep.subr.msk.bf16.mxu0 %vm328_vm0, %v2084_v3  ;;  %1765 = vmatprep.subr.msk.bf16.mxu1 %vm328_vm0, %v2086_v4 }
  0x31   : > { %1757 = vmatmul.mubr.msk.bf16.vlgmr.msra.gmra.mrb[8].mxu0 %vm324_vm1, %v1891_v15  ;;  %1759 = vmatmul.mubr.msk.bf16.vlgmr.msra.gmra.mrb[8].mxu1 %vm324_vm1, %v1891_v15 }
  0x32   : > { %734 = vmatpush1.bf16.msra.mxu0 %v2096_v8  ;;  %765 = vmatprep.mubr.bf16.mxu0 %v1978_v0 }
  0x33   : > { %777 = vmatpush1.bf16.msra.mxu1 %v2099_v9  ;;  %1770 = vmatprep.subr.msk.bf16.mxu0 %vm328_vm0, %v2084_v3 }
  0x34   : > { %808 = vmatprep.mubr.bf16.mxu1 %v1978_v0  ;;  %1772 = vmatprep.subr.msk.bf16.mxu1 %vm328_vm0, %v2086_v4 }
  0x39   : > { %1764 = vmatmul.mubr.msk.bf16.vlgmr.msra.gmra.mrb[12].mxu0 %vm324_vm1, %v1892_v16  ;;  %1766 = vmatmul.mubr.msk.bf16.vlgmr.msra.gmra.mrb[12].mxu1 %vm324_vm1, %v1892_v16 }
  0x3a   : > { %864 = vmatpush1.bf16.msra.mxu0 %v2096_v8  ;;  %895 = vmatprep.mubr.bf16.mxu0 %v1978_v0 }
  0x3b   : > { %907 = vmatpush1.bf16.msra.mxu1 %v2099_v9  ;;  %1777 = vmatprep.subr.msk.bf16.mxu0 %vm328_vm0, %v2084_v3 }
  0x3c   : > { %938 = vmatprep.mubr.bf16.mxu1 %v1978_v0  ;;  %1779 = vmatprep.subr.msk.bf16.mxu1 %vm328_vm0, %v2086_v4 }
  0x41   : > { %1771 = vmatmul.mubr.msk.bf16.vlgmr.msra.gmra.mrb[16].mxu0 %vm324_vm1, %v1893_v17  ;;  %1773 = vmatmul.mubr.msk.bf16.vlgmr.msra.gmra.mrb[16].mxu1 %vm324_vm1, %v1893_v17 }
  0x42   : > { %969 = vmatpush1.bf16.msra.mxu0 %v2096_v8  ;;  %1000 = vmatprep.mubr.bf16.mxu0 %v1978_v0 }
  0x43   : > { %1012 = vmatpush1.bf16.msra.mxu1 %v2099_v9  ;;  %1043 = vmatprep.mubr.bf16.mxu1 %v1978_v0 }
  0x44   : > { %1784 = vmatprep.subr.msk.bf16.mxu0 %vm328_vm0, %v2084_v3  ;;  %1786 = vmatprep.subr.msk.bf16.mxu1 %vm328_vm0, %v2086_v4 }
  0x49   : > { %1778 = vmatmul.mubr.msk.bf16.vlgmr.msra.gmra.mrb[20].mxu0 %vm324_vm1, %v1894_v18  ;;  %1780 = vmatmul.mubr.msk.bf16.vlgmr.msra.gmra.mrb[20].mxu1 %vm324_vm1, %v1894_v18 }
  0x4a   : > { %1099 = vmatpush1.bf16.msra.mxu0 %v2096_v8  ;;  %1130 = vmatprep.mubr.bf16.mxu0 %v1978_v0 }
  0x4b   : > { %1142 = vmatpush1.bf16.msra.mxu1 %v2099_v9  ;;  %1173 = vmatprep.mubr.bf16.mxu1 %v1978_v0 }
  0x4c   : > { %1791 = vmatprep.subr.msk.bf16.mxu0 %vm328_vm0, %v2084_v3  ;;  %1793 = vmatprep.subr.msk.bf16.mxu1 %vm328_vm0, %v2086_v4 }
  0x51   : > { %1785 = vmatmul.mubr.msk.bf16.vlgmr.msra.gmra.mrb[24].mxu0 %vm324_vm1, %v1895_v19  ;;  %1787 = vmatmul.mubr.msk.bf16.vlgmr.msra.gmra.mrb[24].mxu1 %vm324_vm1, %v1895_v19 }
  0x52   : > { %1229 = vmatpush1.bf16.msra.mxu0 %v2096_v8  ;;  %1260 = vmatprep.mubr.bf16.mxu0 %v1978_v0 }
  0x53   : > { %1272 = vmatpush1.bf16.msra.mxu1 %v2099_v9  ;;  %1303 = vmatprep.mubr.bf16.mxu1 %v1978_v0 }
  0x54   : > { %1798 = vmatprep.subr.msk.bf16.mxu0 %vm328_vm0, %v2084_v3  ;;  %1800 = vmatprep.subr.msk.bf16.mxu1 %vm328_vm0, %v2086_v4 }
  0x59   : > { %1792 = vmatmul.mubr.msk.bf16.vlgmr.msra.gmra.mrb[28].mxu0 %vm324_vm1, %v1896_v20  ;;  %1794 = vmatmul.mubr.msk.bf16.vlgmr.msra.gmra.mrb[28].mxu1 %vm324_vm1, %v1896_v20 }
  0x5a   : > { %1359 = vmatpush1.bf16.msra.mxu0 %v2096_v8  ;;  %1390 = vmatprep.mubr.bf16.mxu0 %v1978_v0 }
  0x5b   : > { %1402 = vmatpush1.bf16.msra.mxu1 %v2099_v9  ;;  %1433 = vmatprep.mubr.bf16.mxu1 %v1978_v0 }
  0x61   : > { %1799 = vmatmul.mubr.msk.bf16.vlgmr.msra.gmra.mrb[32].mxu0 %vm324_vm1, %v1897_v21  ;;  %1801 = vmatmul.mubr.msk.bf16.vlgmr.msra.gmra.mrb[32].mxu1 %vm324_vm1, %v1897_v21 }
  0xf4   : > { %v375_v22 = vpop.f32.mrb[0].mxu0  ;;  %v418_v23 = vpop.f32.mrb[0].mxu1 }
  0xf5   : > { %v420_v24 = vpop.f32.mrb[1].mxu1  ;;  %427 = vrot.lane.b32.xlu0 %v375_v22, %s1979_s8  ;;  %v377_v25 = vpop.f32.mrb[1].mxu0 }
  0xf6   : > { %v422_v26 = vpop.f32.mrb[2].mxu1  ;;  %431 = vrot.lane.b32.xlu1 %v377_v25, %s1979_s8  ;;  %v379_v27 = vpop.f32.mrb[2].mxu0 }
  0xf7   : > { %v381_v28 = vpop.f32.mrb[3].mxu0  ;;  %v424_v29 = vpop.f32.mrb[3].mxu1 }
  0xf9   : > { %435 = vrot.lane.b32.xlu0 %v418_v23, %s1979_s8 }
  0xfa   : > { %437 = vrot.lane.b32.xlu1 %v422_v26, %s1979_s8 }
  0xfc   : > { %v507_v30 = vpop.f32.mrb[4].mxu0  ;;  %v550_v31 = vpop.f32.mrb[4].mxu1 }
  0xfd   : > { %439 = vrot.lane.b32.xlu0 %v420_v24, %s1979_s8  ;;  %v509_v32 = vpop.f32.mrb[5].mxu0  ;;  %v552_v33 = vpop.f32.mrb[5].mxu1 }
  0xfe   : > { %433 = vrot.lane.b32.xlu1 %v381_v28, %s1979_s8  ;;  %v511_v34 = vpop.f32.mrb[6].mxu0  ;;  %v554_v35 = vpop.f32.mrb[6].mxu1 }
  0xff   : > { %v513_v36 = vpop.f32.mrb[7].mxu0  ;;  %v556_v37 = vpop.f32.mrb[7].mxu1 }
 0x101   : > { %429 = vrot.lane.b32.xlu0 %v379_v27, %s1979_s8 }
 0x102   : > { %441 = vrot.lane.b32.xlu1 %v424_v29, %s1979_s8 }
 0x104   : > { %v637_v38 = vpop.f32.mrb[8].mxu0  ;;  %v680_v39 = vpop.f32.mrb[8].mxu1 }
 0x105   : > { %559 = vrot.lane.b32.xlu0 %v507_v30, %s1980_s9  ;;  %v639_v40 = vpop.f32.mrb[9].mxu0  ;;  %v682_v41 = vpop.f32.mrb[9].mxu1 }
 0x106   : > { %561 = vrot.lane.b32.xlu1 %v511_v34, %s1980_s9  ;;  %v641_v42 = vpop.f32.mrb[10].mxu0  ;;  %v684_v43 = vpop.f32.mrb[10].mxu1 }
 0x107   : > { %v643_v44 = vpop.f32.mrb[11].mxu0  ;;  %v686_v45 = vpop.f32.mrb[11].mxu1 }
 0x108   : > { %v2237_v30 = vpop.permute.xlu0 %1481 }
 0x109   : > { %567 = vrot.lane.b32.xlu0 %v550_v31, %s1980_s9  ;;  %v2239_v31 = vpop.permute.xlu1 %1486 }
 0x10a   : > { %569 = vrot.lane.b32.xlu1 %v554_v35, %s1980_s9 }
 0x10c   : > { %v767_v46 = vpop.f32.mrb[12].mxu0  ;;  %v810_v47 = vpop.f32.mrb[12].mxu1 }
 0x10d   : > { %563 = vrot.lane.b32.xlu0 %v509_v32, %s1980_s9  ;;  %v769_v48 = vpop.f32.mrb[13].mxu0  ;;  %v812_v49 = vpop.f32.mrb[13].mxu1  ;;  %v443_v32 = vlaneseq }
 0x10e   : > { %565 = vrot.lane.b32.xlu1 %v513_v36, %s1980_s9  ;;  %v771_v50 = vpop.f32.mrb[14].mxu0  ;;  %v814_v51 = vpop.f32.mrb[14].mxu1 }
 0x10f   : > { %v773_v52 = vpop.f32.mrb[15].mxu0  ;;  %v816_v53 = vpop.f32.mrb[15].mxu1 }
 0x110   : > { %v2244_v34 = vpop.permute.xlu0 %1514  ;;  %v2246_v35 = vpop.permute.xlu1 %1509 }
 0x111   : > { %571 = vrot.lane.b32.xlu0 %v552_v33, %s1980_s9  ;;  %v2242_v33 = vand.u32 127, %v443_v32 }
 0x112   : > { %573 = vrot.lane.b32.xlu1 %v556_v37, %s1980_s9 }
 0x113   : > { %vm445_vm2 = vcmp.lt.s32.totalorder %v2242_v33, 23  ;;  %vm575_vm3 = vcmp.lt.s32.totalorder %v2242_v33, 22  ;;  %vm705_vm4 = vcmp.lt.s32.totalorder %v2242_v33, 21  ;;  %vm835_vm5 = vcmp.lt.s32.totalorder %v2242_v33, 1 }
 0x114   : > { %v2221_v54 = vpop.f32.mrb[16].mxu0  ;;  %v2223_v55 = vpop.f32.mrb[16].mxu1  ;;  %vm1070_vm6 = vcmp.lt.s32.totalorder %v2242_v33, 127  ;;  %vm1200_vm7 = vcmp.lt.s32.totalorder %v2242_v33, 107  ;;  %vm1330_vm8 = vcmp.lt.s32.totalorder %v2242_v33, 106  ;;  %vm1460_vm9 = vcmp.lt.s32.totalorder %v2242_v33, 105 }
 0x115   : > { %689 = vrot.lane.b32.xlu0 %v637_v38, %s1981_s10  ;;  %v2225_v56 = vpop.f32.mrb[17].mxu0  ;;  %v2227_v57 = vpop.f32.mrb[17].mxu1 }
 0x116   : > { %691 = vrot.lane.b32.xlu1 %v641_v42, %s1981_s10  ;;  %v2229_v58 = vpop.f32.mrb[18].mxu0  ;;  %v2231_v59 = vpop.f32.mrb[18].mxu1 }
 0x117   : > { %v2233_v60 = vpop.f32.mrb[19].mxu0  ;;  %v2235_v61 = vpop.f32.mrb[19].mxu1 }
 0x119   : > { %697 = vrot.lane.b32.xlu0 %v680_v39, %s1981_s10 }
 0x11a   : > { %699 = vrot.lane.b32.xlu1 %v684_v43, %s1981_s10 }
 0x11c   : > { %v1002_v62 = vpop.f32.mrb[20].mxu0  ;;  %v1045_v63 = vpop.f32.mrb[20].mxu1 }
 0x11d   : > { %693 = vrot.lane.b32.xlu0 %v639_v40, %s1981_s10  ;;  %v1004_v0 = vpop.f32.mrb[21].mxu0  ;;  %v1047_v1 = vpop.f32.mrb[21].mxu1 }
 0x11e   : > { %695 = vrot.lane.b32.xlu1 %v643_v44, %s1981_s10  ;;  %v1006_v2 = vpop.f32.mrb[22].mxu0  ;;  %v1049_v3 = vpop.f32.mrb[22].mxu1 }
 0x11f   : > { %v1008_v4 = vpop.f32.mrb[23].mxu0  ;;  %v1051_v5 = vpop.f32.mrb[23].mxu1 }
 0x121   : > { %701 = vrot.lane.b32.xlu0 %v682_v41, %s1981_s10 }
 0x122   : > { %703 = vrot.lane.b32.xlu1 %v686_v45, %s1981_s10  ;;  %s2468_s10 = scalar_lea.hbm %s2525_s5, %s1816_s29 }
 0x124   : > { %v1132_v6 = vpop.f32.mrb[24].mxu0  ;;  %v1175_v7 = vpop.f32.mrb[24].mxu1 }
 0x125   : > { %819 = vrot.lane.b32.xlu0 %v767_v46, %s1982_s11  ;;  %v1134_v8 = vpop.f32.mrb[25].mxu0  ;;  %v1177_v9 = vpop.f32.mrb[25].mxu1 }
 0x126   : > { %821 = vrot.lane.b32.xlu1 %v771_v50, %s1982_s11  ;;  %v1136_v10 = vpop.f32.mrb[26].mxu0  ;;  %v1179_v11 = vpop.f32.mrb[26].mxu1 }
 0x127   : > { %v1138_v12 = vpop.f32.mrb[27].mxu0  ;;  %v1181_v13 = vpop.f32.mrb[27].mxu1 }
 0x129   : > { %827 = vrot.lane.b32.xlu0 %v810_v47, %s1982_s11 }
 0x12a   : > { %829 = vrot.lane.b32.xlu1 %v814_v51, %s1982_s11 }
 0x12c   : > { %v1262_v14 = vpop.f32.mrb[28].mxu0  ;;  %v1305_v15 = vpop.f32.mrb[28].mxu1 }
 0x12d   : > { %823 = vrot.lane.b32.xlu0 %v769_v48, %s1982_s11  ;;  %v1264_v16 = vpop.f32.mrb[29].mxu0  ;;  %v1307_v17 = vpop.f32.mrb[29].mxu1 }
 0x12e   : > { %825 = vrot.lane.b32.xlu1 %v773_v52, %s1982_s11  ;;  %v1266_v18 = vpop.f32.mrb[30].mxu0  ;;  %v1309_v19 = vpop.f32.mrb[30].mxu1 }
 0x12f   : > { %v1268_v20 = vpop.f32.mrb[31].mxu0  ;;  %v1311_v21 = vpop.f32.mrb[31].mxu1 }
 0x131   : > { %831 = vrot.lane.b32.xlu0 %v812_v49, %s1982_s11 }
 0x132   : > { %833 = vrot.lane.b32.xlu1 %v816_v53, %s1982_s11  ;;  %s1898_s11 = scalar_lea.vmem %s2470_s7, 512 }
 0x133   : > { %p1899_p12 = scmp.ne.s32.totalorder %s2470_s7, %s1898_s11 }
 0x134   : > { %v1392_v22 = vpop.f32.mrb[32].mxu0  ;;  %v1435_v23 = vpop.f32.mrb[32].mxu1 }
 0x135   : > { %1054 = vrot.lane.b32.xlu0 %v1002_v62, %s1983_s12  ;;  %v1394_v24 = vpop.f32.mrb[33].mxu0  ;;  %v1437_v25 = vpop.f32.mrb[33].mxu1  ;;  %p1900_p13 = pnand %p1899_p12, %p2060_p4 }
 0x136   : > { %1056 = vrot.lane.b32.xlu1 %v1006_v2, %s1983_s12  ;;  %v1396_v26 = vpop.f32.mrb[34].mxu0  ;;  %v1439_v27 = vpop.f32.mrb[34].mxu1 }
 0x137   : > { %v1398_v28 = vpop.f32.mrb[35].mxu0  ;;  %v1441_v29 = vpop.f32.mrb[35].mxu1  ;;  %p1901_p0 = pneg %p1900_p13 }
 0x139   : > { %1062 = vrot.lane.b32.xlu0 %v1045_v63, %s1983_s12 }
 0x13a   : > { %1064 = vrot.lane.b32.xlu1 %v1049_v3, %s1983_s12 }
 0x13d   : > { %1058 = vrot.lane.b32.xlu0 %v1004_v0, %s1983_s12 }
 0x13e   : > { %1060 = vrot.lane.b32.xlu1 %v1008_v4, %s1983_s12 }
 0x141   : > { %1066 = vrot.lane.b32.xlu0 %v1047_v1, %s1983_s12 }
 0x142   : > { %1068 = vrot.lane.b32.xlu1 %v1051_v5, %s1983_s12  ;;  %s1987_s12 = smov [#allocation2]  }
 0x145   : > { %1184 = vrot.lane.b32.xlu0 %v1132_v6, %s1984_s13 }
 0x146   : > { %1186 = vrot.lane.b32.xlu1 %v1136_v10, %s1984_s13 }
 0x149   : > { %1192 = vrot.lane.b32.xlu0 %v1175_v7, %s1984_s13 }
 0x14a   : > { %1194 = vrot.lane.b32.xlu1 %v1179_v11, %s1984_s13 }
 0x14d   : > { %1188 = vrot.lane.b32.xlu0 %v1134_v8, %s1984_s13 }
 0x14e   : > { %1190 = vrot.lane.b32.xlu1 %v1138_v12, %s1984_s13 }
 0x151   : > { %1196 = vrot.lane.b32.xlu0 %v1177_v9, %s1984_s13 }
 0x152   : > { %1198 = vrot.lane.b32.xlu1 %v1181_v13, %s1984_s13  ;;  %s1902_s13 = sshll.u32 %s1987_s12, 4  ;;  %s1903_s13 = int_to_ptr.vmem [resolvable:$false] %s1902_s13 }
 0x153   : > { %p1905_p1 = scmp.lt.s32.totalorder %s2470_s7, %s1903_s13 }
 0x155   : > { %1316 = vrot.lane.b32.xlu0 %v1266_v18, %s1985_s14 }
 0x156   : > { %1314 = vrot.lane.b32.xlu1 %v1262_v14, %s1985_s14 }
 0x159   : > { %1324 = vrot.lane.b32.xlu0 %v1309_v19, %s1985_s14 }
 0x15a   : > { %1322 = vrot.lane.b32.xlu1 %v1305_v15, %s1985_s14 }
 0x15d   : > { %1320 = vrot.lane.b32.xlu0 %v1268_v20, %s1985_s14 }
 0x15e   : > { %1318 = vrot.lane.b32.xlu1 %v1264_v16, %s1985_s14 }
 0x161   : > { %1328 = vrot.lane.b32.xlu0 %v1311_v21, %s1985_s14 }
 0x162   : > { %1326 = vrot.lane.b32.xlu1 %v1307_v17, %s1985_s14  ;;  %s1904_s14 = scalar_lea.vmem %s1903_s13, 1024 }
 0x163   : > { %p1906_p2 = scmp.lt.s32.totalorder %s1904_s14, %s1898_s11 }
 0x165   : > { %1446 = vrot.lane.b32.xlu0 %v1396_v26, %s1986_s15  ;;  %p1907_p3 = por %p1906_p2, %p1905_p1 }
 0x166   : > { %1444 = vrot.lane.b32.xlu1 %v1392_v22, %s1986_s15 }
 0x167   : > { %v428_v36 = vpop.permute.xlu0 %427  ;;  %p1908_p5 = pnand %p1907_p3, %p1901_p0 }
 0x168   : > { %v432_v37 = vpop.permute.xlu1 %431 }
 0x169   : > { %v450_v38 = vsel %vm445_vm2, %v428_v36, %v432_v37  ;;  %1454 = vrot.lane.b32.xlu0 %v1439_v27, %s1986_s15 }
 0x16a   : > { %1452 = vrot.lane.b32.xlu1 %v1435_v23, %s1986_s15 }
 0x16b   : > { %v436_v39 = vpop.permute.xlu0 %435 }
 0x16c   : > { %v448_v40 = vsel %vm445_vm2, %v432_v37, %v436_v39  ;;  %v438_v41 = vpop.permute.xlu1 %437 }
 0x16d   : > { %1450 = vrot.lane.b32.xlu0 %v1398_v28, %s1986_s15 }
 0x16e   : > { %1448 = vrot.lane.b32.xlu1 %v1394_v24, %s1986_s15 }
 0x16f   : > { %v440_v42 = vpop.permute.xlu0 %439 }
 0x170   : > { %v446_v43 = vsel %vm445_vm2, %v436_v39, %v440_v42  ;;  %v452_v44 = vsel %vm445_vm2, %v440_v42, %v428_v36  ;;  %v434_v45 = vpop.permute.xlu1 %433 }
 0x171   : > { %v449_v46 = vsel %vm445_vm2, %v434_v45, %v438_v41  ;;  %1458 = vrot.lane.b32.xlu0 %v1441_v29, %s1986_s15 }
 0x172   : > { %1456 = vrot.lane.b32.xlu1 %v1437_v25, %s1986_s15 }
 0x173   : > { %v430_v47 = vpop.permute.xlu0 %429 }
 0x174   : > { %v451_v48 = vsel %vm445_vm2, %v430_v47, %v434_v45  ;;  %v442_v49 = vpop.permute.xlu1 %441 }
 0x175   : > { %v447_v50 = vsel %vm445_vm2, %v438_v41, %v442_v49  ;;  %v453_v51 = vsel %vm445_vm2, %v442_v49, %v430_v47 }
 0x177   : > { %v560_v52 = vpop.permute.xlu0 %559 }
 0x178   : > { %v562_v53 = vpop.permute.xlu1 %561 }
 0x17b   : > { %v568_v62 = vpop.permute.xlu0 %567 }
 0x17c   : > { %v570_v63 = vpop.permute.xlu1 %569 }
 0x17f   : > { %v564_v0 = vpop.permute.xlu0 %563 }
 0x180   : > { %v578_v1 = vsel %vm575_vm3, %v564_v0, %v568_v62  ;;  %v580_v2 = vsel %vm575_vm3, %v560_v52, %v564_v0  ;;  %v566_v3 = vpop.permute.xlu1 %565 }
 0x181   : > { %v585_v4 = vadd.f32 %v580_v2, %v450_v38  ;;  %v586_v5 = vadd.f32 %v578_v1, %v448_v40  ;;  %v579_v6 = vsel %vm575_vm3, %v566_v3, %v570_v63  ;;  %v581_v7 = vsel %vm575_vm3, %v562_v53, %v566_v3 }
 0x182   : > { %v589_v8 = vadd.f32 %v581_v7, %v451_v48  ;;  %v590_v9 = vadd.f32 %v579_v6, %v449_v46 }
 0x183   : > { %v572_v10 = vpop.permute.xlu0 %571 }
 0x184   : > { %v576_v11 = vsel %vm575_vm3, %v568_v62, %v572_v10  ;;  %v582_v12 = vsel %vm575_vm3, %v572_v10, %v560_v52  ;;  %v574_v13 = vpop.permute.xlu1 %573 }
 0x185   : > { %v584_v14 = vadd.f32 %v582_v12, %v452_v44  ;;  %v587_v15 = vadd.f32 %v576_v11, %v446_v43  ;;  %v577_v16 = vsel %vm575_vm3, %v570_v63, %v574_v13  ;;  %v583_v17 = vsel %vm575_vm3, %v574_v13, %v562_v53 }
 0x186   : > { %v588_v18 = vadd.f32 %v583_v17, %v453_v51  ;;  %v591_v19 = vadd.f32 %v577_v16, %v447_v50 }
 0x187   : > { %v690_v20 = vpop.permute.xlu0 %689 }
 0x188   : > { %v692_v21 = vpop.permute.xlu1 %691 }
 0x18b   : > { %v698_v22 = vpop.permute.xlu0 %697 }
 0x18c   : > { %v700_v23 = vpop.permute.xlu1 %699 }
 0x18f   : > { %v694_v24 = vpop.permute.xlu0 %693 }
 0x190   : > { %v708_v25 = vsel %vm705_vm4, %v694_v24, %v698_v22  ;;  %v710_v26 = vsel %vm705_vm4, %v690_v20, %v694_v24  ;;  %v696_v27 = vpop.permute.xlu1 %695 }
 0x191   : > { %v715_v28 = vadd.f32 %v710_v26, %v585_v4  ;;  %v716_v29 = vadd.f32 %v708_v25, %v586_v5  ;;  %v709_v36 = vsel %vm705_vm4, %v696_v27, %v700_v23  ;;  %v711_v37 = vsel %vm705_vm4, %v692_v21, %v696_v27 }
 0x192   : > { %v719_v38 = vadd.f32 %v711_v37, %v589_v8  ;;  %v720_v39 = vadd.f32 %v709_v36, %v590_v9 }
 0x193   : > { %v702_v40 = vpop.permute.xlu0 %701 }
 0x194   : > { %v706_v41 = vsel %vm705_vm4, %v698_v22, %v702_v40  ;;  %v712_v42 = vsel %vm705_vm4, %v702_v40, %v690_v20  ;;  %v704_v43 = vpop.permute.xlu1 %703 }
 0x195   : > { %v714_v44 = vadd.f32 %v712_v42, %v584_v14  ;;  %v717_v45 = vadd.f32 %v706_v41, %v587_v15  ;;  %v707_v46 = vsel %vm705_vm4, %v700_v23, %v704_v43  ;;  %v713_v47 = vsel %vm705_vm4, %v704_v43, %v692_v21 }
 0x196   : > { %v718_v48 = vadd.f32 %v713_v47, %v588_v18  ;;  %v721_v49 = vadd.f32 %v707_v46, %v591_v19 }
 0x197   : > { %v820_v50 = vpop.permute.xlu0 %819 }
 0x198   : > { %v822_v51 = vpop.permute.xlu1 %821 }
 0x19b   : > { %v828_v52 = vpop.permute.xlu0 %827 }
 0x19c   : > { %v830_v53 = vpop.permute.xlu1 %829 }
 0x19f   : > { %v824_v62 = vpop.permute.xlu0 %823 }
 0x1a0   : > { %v838_v63 = vsel %vm835_vm5, %v824_v62, %v828_v52  ;;  %v840_v0 = vsel %vm835_vm5, %v820_v50, %v824_v62  ;;  %v826_v1 = vpop.permute.xlu1 %825 }
 0x1a1   : > { %v845_v2 = vadd.f32 %v840_v0, %v715_v28  ;;  %v846_v3 = vadd.f32 %v838_v63, %v716_v29  ;;  %v839_v4 = vsel %vm835_vm5, %v826_v1, %v830_v53  ;;  %v841_v5 = vsel %vm835_vm5, %v822_v51, %v826_v1 }
 0x1a2   : > { %v849_v6 = vadd.f32 %v841_v5, %v719_v38  ;;  %v850_v7 = vadd.f32 %v839_v4, %v720_v39 }
 0x1a3   : > { %v832_v8 = vpop.permute.xlu0 %831  ;;  %v2309_v9 = vadd.f32 %v2225_v56, %v845_v2  ;;  %v2312_v10 = vadd.f32 %v2223_v55, %v846_v3 }
 0x1a4   : > { %v836_v11 = vsel %vm835_vm5, %v828_v52, %v832_v8  ;;  %v842_v12 = vsel %vm835_vm5, %v832_v8, %v820_v50  ;;  %v834_v13 = vpop.permute.xlu1 %833  ;;  %v954_v14 = vadd.f32 %v2233_v60, %v849_v6  ;;  %v2320_v15 = vadd.f32 %v2231_v59, %v850_v7  ;;  %v1533_v50 = vld [vmem:[%s2524_s4] sm:$0xf] }
 0x1a5   : > { %v844_v16 = vadd.f32 %v842_v12, %v714_v44  ;;  %v847_v17 = vadd.f32 %v836_v11, %v717_v45  ;;  %v837_v56 = vsel %vm835_vm5, %v830_v53, %v834_v13  ;;  %v843_v55 = vsel %vm835_vm5, %v834_v13, %v822_v51 }
 0x1a6   : > { %v848_v18 = vadd.f32 %v843_v55, %v718_v48  ;;  %v851_v19 = vadd.f32 %v837_v56, %v721_v49  ;;  %v1536_v44 = vshrl.u32 %v443_v32, 7 }
 0x1a7   : > { %v1055_v20 = vpop.permute.xlu0 %1054  ;;  %v949_v21 = vadd.f32 %v2221_v54, %v844_v16  ;;  %v952_v22 = vadd.f32 %v2227_v57, %v847_v17 }
 0x1a8   : > { %v1057_v23 = vpop.permute.xlu1 %1056  ;;  %v953_v60 = vadd.f32 %v2229_v58, %v848_v18  ;;  %v956_v59 = vadd.f32 %v2235_v61, %v851_v19  ;;  %v1537_v47 = vsub.s32 0, %v1536_v44  ;;  %v1541_v48 = vsub.s32 1, %v1536_v44 }
 0x1a9   : > { %v1545_v51 = vsub.s32 2, %v1536_v44  ;;  %v1549_v52 = vsub.s32 3, %v1536_v44 }
 0x1aa   : > { %v2362_v4 = vrot.slane %v1533_v50, %v1537_v47  ;;  %v2364_v5 = vrot.slane %v1533_v50, %v1541_v48 }
 0x1ab   : > { %v1063_v24 = vpop.permute.xlu0 %1062  ;;  %v2368_v11 = vrot.slane %v1533_v50, %v1545_v51  ;;  %v2370_v12 = vrot.slane %v1533_v50, %v1549_v52 }
 0x1ac   : > { %v1065_v25 = vpop.permute.xlu1 %1064 }
 0x1af   : > { %v1059_v26 = vpop.permute.xlu0 %1058 }
 0x1b0   : > { %v1061_v27 = vpop.permute.xlu1 %1060  ;;  %v1075_v53 = vsel %vm1070_vm6, %v1055_v20, %v1059_v26  ;;  %v1073_v62 = vsel %vm1070_vm6, %v1059_v26, %v1063_v24 }
 0x1b1   : > { %v1074_v63 = vsel %vm1070_vm6, %v1061_v27, %v1065_v25  ;;  %v1076_v0 = vsel %vm1070_vm6, %v1057_v23, %v1061_v27  ;;  %v1079_v6 = vadd.f32 %v1075_v53, %v949_v21  ;;  %v1080_v13 = vadd.f32 %v1073_v62, %v2309_v9 }
 0x1b2   : > { %v1083_v16 = vadd.f32 %v1076_v0, %v953_v60  ;;  %v1084_v17 = vadd.f32 %v1074_v63, %v954_v14 }
 0x1b3   : > { %v1067_v28 = vpop.permute.xlu0 %1066 }
 0x1b4   : > { %v1069_v29 = vpop.permute.xlu1 %1068  ;;  %v1071_v1 = vsel %vm1070_vm6, %v1063_v24, %v1067_v28  ;;  %v1077_v2 = vsel %vm1070_vm6, %v1067_v28, %v1055_v20 }
 0x1b5   : > { %v1072_v3 = vsel %vm1070_vm6, %v1065_v25, %v1069_v29  ;;  %v1078_v7 = vsel %vm1070_vm6, %v1069_v29, %v1057_v23  ;;  %v1081_v56 = vadd.f32 %v1071_v1, %v2312_v10  ;;  %v1082_v18 = vadd.f32 %v1077_v2, %v952_v22 }
 0x1b6   : > { %v1085_v19 = vadd.f32 %v1072_v3, %v2320_v15  ;;  %v1086_v23 = vadd.f32 %v1078_v7, %v956_v59 }
 0x1b7   : > { %v1185_v36 = vpop.permute.xlu0 %1184 }
 0x1b8   : > { %v1187_v37 = vpop.permute.xlu1 %1186 }
 0x1bb   : > { %v1193_v38 = vpop.permute.xlu0 %1192 }
 0x1bc   : > { %v1195_v39 = vpop.permute.xlu1 %1194 }
 0x1bf   : > { %v1189_v40 = vpop.permute.xlu0 %1188 }
 0x1c0   : > { %v1191_v41 = vpop.permute.xlu1 %1190  ;;  %v1205_v20 = vsel %vm1200_vm7, %v1185_v36, %v1189_v40  ;;  %v1203_v24 = vsel %vm1200_vm7, %v1189_v40, %v1193_v38 }
 0x1c1   : > { %v1206_v21 = vsel %vm1200_vm7, %v1187_v37, %v1191_v41  ;;  %v1204_v9 = vsel %vm1200_vm7, %v1191_v41, %v1195_v39  ;;  %v1209_v25 = vadd.f32 %v1205_v20, %v1079_v6 }
 0x1c2   : > { %v1213_v26 = vadd.f32 %v1206_v21, %v1083_v16 }
 0x1c3   : > { %v1197_v54 = vpop.permute.xlu0 %1196 }
 0x1c4   : > { %v1199_v42 = vpop.permute.xlu1 %1198  ;;  %v1201_v10 = vsel %vm1200_vm7, %v1193_v38, %v1197_v54  ;;  %v1207_v14 = vsel %vm1200_vm7, %v1197_v54, %v1185_v36  ;;  %v1210_v36 = vadd.f32 %v1203_v24, %v1080_v13  ;;  %v1214_v38 = vadd.f32 %v1204_v9, %v1084_v17 }
 0x1c5   : > { %v1202_v15 = vsel %vm1200_vm7, %v1195_v39, %v1199_v42  ;;  %v1208_v22 = vsel %vm1200_vm7, %v1199_v42, %v1187_v37  ;;  %v1211_v39 = vadd.f32 %v1201_v10, %v1081_v56  ;;  %v1212_v40 = vadd.f32 %v1207_v14, %v1082_v18 }
 0x1c6   : > { %v1215_v41 = vadd.f32 %v1202_v15, %v1085_v19  ;;  %v1216_v54 = vadd.f32 %v1208_v22, %v1086_v23 }
 0x1c7   : > { %v2330_v57 = vpop.permute.xlu0 %1316 }
 0x1c8   : > { %v2332_v43 = vpop.permute.xlu1 %1314 }
 0x1cb   : > { %v2334_v58 = vpop.permute.xlu0 %1324 }
 0x1cc   : > { %v2336_v61 = vpop.permute.xlu1 %1322 }
 0x1cf   : > { %v1321_v45 = vpop.permute.xlu0 %1320 }
 0x1d0   : > { %v1319_v46 = vpop.permute.xlu1 %1318  ;;  %v1336_v60 = vsel %vm1330_vm8, %v2330_v57, %v1321_v45  ;;  %v1334_v27 = vsel %vm1330_vm8, %v1321_v45, %v2334_v58 }
 0x1d1   : > { %v1335_v28 = vsel %vm1330_vm8, %v2332_v43, %v1319_v46  ;;  %v1333_v37 = vsel %vm1330_vm8, %v1319_v46, %v2336_v61  ;;  %v1343_v42 = vadd.f32 %v1336_v60, %v1213_v26  ;;  %v1344_v44 = vadd.f32 %v1334_v27, %v1214_v38 }
 0x1d2   : > { %v1339_v47 = vadd.f32 %v1335_v28, %v1209_v25  ;;  %v1340_v51 = vadd.f32 %v1333_v37, %v1210_v36 }
 0x1d3   : > { %v1329_v49 = vpop.permute.xlu0 %1328 }
 0x1d4   : > { %v2347_v32 = vpop.permute.xlu1 %1326  ;;  %v1332_v45 = vsel %vm1330_vm8, %v2334_v58, %v1329_v49  ;;  %v1338_v48 = vsel %vm1330_vm8, %v1329_v49, %v2330_v57 }
 0x1d5   : > { %v1331_v46 = vsel %vm1330_vm8, %v2336_v61, %v2347_v32  ;;  %v1345_v0 = vadd.f32 %v1332_v45, %v1215_v41  ;;  %v1346_v1 = vadd.f32 %v1338_v48, %v1216_v54  ;;  %v1337_v3 = vsel %vm1330_vm8, %v2347_v32, %v2332_v43 }
 0x1d6   : > { %v1341_v6 = vadd.f32 %v1331_v46, %v1211_v39  ;;  %v1342_v28 = vadd.f32 %v1337_v3, %v1212_v40 }
 0x1d7   : > { %v1447_v8 = vpop.permute.xlu0 %1446 }
 0x1d8   : > { %v2374_v55 = vpop.permute.xlu1 %1444 }
 0x1db   : > { %v1455_v59 = vpop.permute.xlu0 %1454 }
 0x1dc   : > { %v1453_v29 = vpop.permute.xlu1 %1452 }
 0x1df   : > { %v1451_v50 = vpop.permute.xlu0 %1450 }
 0x1e0   : > { %v1464_v52 = vsel %vm1460_vm9, %v1451_v50, %v1455_v59  ;;  %v1466_v53 = vsel %vm1460_vm9, %v1447_v8, %v1451_v50  ;;  %v1449_v62 = vpop.permute.xlu1 %1448 }
 0x1e1   : > { %v1473_v58 = vadd.f32 %v1466_v53, %v1343_v42  ;;  %v1474_v63 = vadd.f32 %v1464_v52, %v1344_v44  ;;  %v1463_v57 = vsel %vm1460_vm9, %v1449_v62, %v1453_v29  ;;  %v1465_v49 = vsel %vm1460_vm9, %v2374_v55, %v1449_v62 }
 0x1e2   : > { %v1469_v2 = vadd.f32 %v1465_v49, %v1339_v47  ;;  %v1470_v61 = vadd.f32 %v1463_v57, %v1340_v51 }
 0x1e3   : > { %v1493_v7 = vadd.f32 %v2239_v31, %v1473_v58  ;;  %v1494_v13 = vadd.f32 %v2239_v31, %v1474_v63  ;;  %v1459_v16 = vpop.permute.xlu0 %1458 }
 0x1e4   : > { %v1489_v17 = vadd.f32 %v2237_v30, %v1469_v2  ;;  %v1490_v56 = vadd.f32 %v2237_v30, %v1470_v61  ;;  %v1462_v18 = vsel %vm1460_vm9, %v1455_v59, %v1459_v16  ;;  %v1468_v19 = vsel %vm1460_vm9, %v1459_v16, %v1447_v8  ;;  %v1457_v14 = vpop.permute.xlu1 %1456 }
 0x1e5   : > { %vm1501_vm10 = vcmp.ge.f32.partialorder %v1493_v7, 0.0  ;;  %vm1502_vm11 = vcmp.ge.f32.partialorder %v1494_v13, 0.0  ;;  %v1521_v43 = vmul.f32 %v2244_v34, %v1493_v7  ;;  %v1522_v32 = vmul.f32 %v2244_v34, %v1494_v13 }
 0x1e6   : > { %vm1497_vm12 = vcmp.ge.f32.partialorder %v1489_v17, 0.0  ;;  %vm1498_vm13 = vcmp.ge.f32.partialorder %v1490_v56, 0.0  ;;  %v1517_v20 = vmul.f32 %v2246_v35, %v1489_v17  ;;  %v1518_v21 = vmul.f32 %v2246_v35, %v1490_v56 }
 0x1e7   : > { %v1529_v23 = vsel %vm1501_vm10, %v1493_v7, %v1521_v43  ;;  %v1530_v24 = vsel %vm1502_vm11, %v1494_v13, %v1522_v32  ;;  %v1475_v9 = vadd.f32 %v1462_v18, %v1345_v0  ;;  %v1476_v10 = vadd.f32 %v1468_v19, %v1346_v1 }
 0x1e8   : > { %v1559_v8 = vmul.f32 %v2362_v4, %v1529_v23  ;;  %v1560_v15 = vmul.f32 %v2364_v5, %v1530_v24  ;;  %v1525_v22 = vsel %vm1497_vm12, %v1489_v17, %v1517_v20  ;;  %v1526_v60 = vsel %vm1498_vm13, %v1490_v56, %v1518_v21 }
 0x1e9   : > { %v1555_v59 = vmul.f32 %v2362_v4, %v1525_v22  ;;  %v1556_v25 = vmul.f32 %v2364_v5, %v1526_v60  ;;  %v1495_v26 = vadd.f32 %v2239_v31, %v1475_v9  ;;  %v1496_v27 = vadd.f32 %v2239_v31, %v1476_v10 }
 0x1ea   : > { %v1814_v36 = vpack.c.bf16 %v1560_v15, %v1559_v8  ;;  %v1461_v38 = vsel %vm1460_vm9, %v1453_v29, %v1457_v14  ;;  %v1467_v39 = vsel %vm1460_vm9, %v1457_v14, %v2374_v55 }
 0x1eb   : > { %v1812_v37 = vpack.c.bf16 %v1556_v25, %v1555_v59  ;;  %vm1503_vm14 = vcmp.ge.f32.partialorder %v1495_v26, 0.0  ;;  %vm1504_vm15 = vcmp.ge.f32.partialorder %v1496_v27, 0.0  ;;  %v1523_v4 = vmul.f32 %v2244_v34, %v1495_v26 }
 0x1ec   : > { %1589 = vst [vmem:[%s279_s27 + $0x10] sm:$0xff] %v1814_v36  ;;  %v1524_v5 = vmul.f32 %v2244_v34, %v1496_v27  ;;  %v1471_v31 = vadd.f32 %v1461_v38, %v1341_v6  ;;  %v1472_v40 = vadd.f32 %v1467_v39, %v1342_v28 }
 0x1ed   : > { %1587 = vst [vmem:[%s279_s27] sm:$0xff] %v1812_v37  ;;  %v1531_v41 = vsel %vm1503_vm14, %v1495_v26, %v1523_v4 }
 0x1ee   : > { %v1532_v54 = vsel %vm1504_vm15, %v1496_v27, %v1524_v5  ;;  %v1561_v29 = vmul.f32 %v2368_v11, %v1531_v41  ;;  %v1491_v33 = vadd.f32 %v2237_v30, %v1471_v31  ;;  %v1492_v55 = vadd.f32 %v2237_v30, %v1472_v40 }
 0x1ef   : > { %v1562_v42 = vmul.f32 %v2370_v12, %v1532_v54 }
 0x1f0   : > { %vm1499_vm0 = vcmp.ge.f32.partialorder %v1491_v33, 0.0  ;;  %vm1500_vm1 = vcmp.ge.f32.partialorder %v1492_v55, 0.0  ;;  %v1519_v44 = vmul.f32 %v2246_v35, %v1491_v33  ;;  %v1520_v34 = vmul.f32 %v2246_v35, %v1492_v55 }
 0x1f1   : > { %v1815_v47 = vpack.c.bf16 %v1562_v42, %v1561_v29 }
 0x1f2   : > { %v1527_v45 = vsel %vm1499_vm0, %v1491_v33, %v1519_v44  ;;  %v1528_v48 = vsel %vm1500_vm1, %v1492_v55, %v1520_v34 }
 0x1f3   : > { %1590 = vst [vmem:[%s279_s27 + $0x18] sm:$0xff] %v1815_v47  ;;  %v1557_v50 = vmul.f32 %v2368_v11, %v1527_v45  ;;  %v1558_v30 = vmul.f32 %v2370_v12, %v1528_v48 }
 0x1f5   : > { %v1813_v35 = vpack.c.bf16 %v1558_v30, %v1557_v50 }
 0x1f7   : > { %1588 = vst [vmem:[%s279_s27 + $0x8] sm:$0xff] %v1813_v35 }
 0x1f8   : > { %1911 = shalt.err (!%p1908_p5)
}
 0x1f9   : > { %s1912_s15 = scalar_lea.hbm %s2468_s10, 512  ;;  %s1916_s24 = scalar_lea.hbm %s2525_s5, 1024 }
 0x1fa   : > { %p1913_p6 = scmp.ne.s32.totalorder %s2468_s10, %s1912_s15  ;;  %p1917_p10 = scmp.lt.u32.totalorder %s2468_s10, %s2525_s5 }
 0x1fb   : > { %p1918_p11 = scmp.lt.u32.totalorder %s1916_s24, %s1912_s15  ;;  %p1920_p13 = scmp.lt.u32.totalorder %s1912_s15, %s2468_s10 }
 0x1fc   : > { %p1914_p7 = pnand %p1913_p6, %p2060_p4 }
 0x1fd   : > { %p1919_p12 = por %p1918_p11, %p1917_p10 }
 0x1fe   : > { %p1915_p9 = pneg %p1914_p7 }
 0x1ff   : > { %p1921_p0 = por %p1920_p13, %p1919_p12 }
 0x201   : > { %p1922_p1 = pnand %p1921_p0, %p1915_p9 }
 0x203   : > { %1925 = shalt.err (!%p1922_p1)
}
 0x204   : > { %s1988_s29 = smov 256   ;;  %s1989_s8 = smov 16  }
 0x205   : > { %1817 = dma.vmem_to_hbm [thread:$0]  (%p2060_p4), %s2470_s7, 512, %s2468_s10, %s2474_s21, %s1988_s29, %s1988_s29, %s1989_s8  }
 0x206 PF: > { %p1823_p2 = scmp.ge.s32.totalorder %s1976_s23, 2  ;;  %s1623_s9 = sand.u32 1, %s1956_s18  }
 0x207   : > { %s1624_s11 = scalar_lea.sflag [#allocation3], %s1623_s9 }
 0x208   : > { %p1820_p3 = pnand %p1823_p2, %p2067_p8 }
 0x20a   : > { %1951 = dma.done.wait (!%p1820_p3), %s1624_s11, 512  }
 0x20b   : > { %1953 = vsyncadd (!%p1820_p3), %s1624_s11, 4294966784  ;;  %s18_s23 = sadd.s32 1, %s1976_s23   ;;  %s2528_s18 = smov %s1960_s19 }
 0x20c   : > { %p15_p5 = scmp.ge.s32.totalorder %s18_s23, 4   ;;  %s2529_s19 = smov %s1964_s20 }
 0x20d   : > { %s2530_s20 = smov %s2073_s6  ;;  %s2531_s21 = smov %s1972_s22 }
 0x20e   : > { %s2532_s22 = smov %s2534_s26  ;;  %17 = sbr.rel (!%p15_p5) target bundleno = 4 (0x4), region = 92 }
 0x215   :  { %1629 = vsyncpa [#allocation3], 1 }
 0x216   :  { %1631 = vsyncpa [#allocation3 + $0x1], 1 }

</bundles_post_ra>
